<compile_context>
chip_gen: v6e
topology: v6e:2x2x1
jax: 0.10.0
libtpu: 0.0.40
codegen_flags: <defaults>
</compile_context>

<pallas_src>
import functools

import jax
import jax.numpy as jnp
from jax.experimental import pallas as pl
from jax.experimental.pallas import tpu as pltpu

HIDDEN = 256
LANE = 128


def _actor_critic_kernel(n_actions,
                         x_ref,
                         w1_ref, b1_ref,                      # fused layer 1
                         wp2_ref, bp2_ref, wp3_ref, bp3_ref,  # policy layers 2/3
                         wv2_ref, bv2_ref, wv3_ref, bv3_ref,  # value  layers 2/3
                         probs_ref, value_ref):
    # ---- fused layer 1 (policy | value share input x) -> one MXU matmul ----
    x = x_ref[...].astype(jnp.bfloat16)
    h1 = jnp.tanh(jnp.dot(x, w1_ref[...],
                          preferred_element_type=jnp.float32) + b1_ref[...])
    h = h1[:, :HIDDEN]      # policy branch activations (f32)
    v = h1[:, HIDDEN:]      # value branch activations (f32)

    # ---------------- policy net ----------------
    h = jnp.tanh(jnp.dot(h.astype(jnp.bfloat16), wp2_ref[...],
                         preferred_element_type=jnp.float32) + bp2_ref[...])
    logits = jnp.dot(h.astype(jnp.bfloat16), wp3_ref[...],
                     preferred_element_type=jnp.float32) + bp3_ref[...]

    # mask the zero-padded action lanes before softmax
    col = jax.lax.broadcasted_iota(jnp.int32, logits.shape, 1)
    logits = jnp.where(col < n_actions, logits, -jnp.inf)

    # numerically-stable softmax over the last dim (f32)
    m = jnp.max(logits, axis=-1, keepdims=True)
    e = jnp.exp(logits - m)
    s = jnp.sum(e, axis=-1, keepdims=True)
    probs_ref[...] = e * pl.reciprocal(s, approx=True)

    # ---------------- value net ----------------
    v = jnp.tanh(jnp.dot(v.astype(jnp.bfloat16), wv2_ref[...],
                         preferred_element_type=jnp.float32) + bv2_ref[...])
    value_ref[...] = jnp.dot(v.astype(jnp.bfloat16), wv3_ref[...],
                             preferred_element_type=jnp.float32) + bv3_ref[...]


def _pad_last(a, target):
    pad = target - a.shape[-1]
    if pad <= 0:
        return a
    cfg = [(0, 0)] * (a.ndim - 1) + [(0, pad)]
    return jnp.pad(a, cfg)


def init_params(key, state_size, n_actions):
    """Raw f32 params matching the module: xavier_uniform_ weights, bias=0.01.
    Weights are stored transposed ([in, out]) relative to nn.Linear."""
    def xavier(k, fan_in, fan_out):
        limit = jnp.sqrt(6.0 / (fan_in + fan_out))
        return jax.random.uniform(k, (fan_in, fan_out), jnp.float32, -limit, limit)

    ks = jax.random.split(key, 6)
    bias = lambda n: jnp.full((1, n), 0.01, jnp.float32)

    wp1 = xavier(ks[0], state_size, HIDDEN); bp1 = bias(HIDDEN)
    wp2 = xavier(ks[1], HIDDEN, HIDDEN);     bp2 = bias(HIDDEN)
    wp3 = xavier(ks[2], HIDDEN, n_actions);  bp3 = bias(n_actions)

    wv1 = xavier(ks[3], state_size, HIDDEN); bv1 = bias(HIDDEN)
    wv2 = xavier(ks[4], HIDDEN, HIDDEN);     bv2 = bias(HIDDEN)
    wv3 = xavier(ks[5], HIDDEN, 1);          bv3 = bias(1)

    return (wp1, bp1, wp2, bp2, wp3, bp3,
            wv1, bv1, wv2, bv2, wv3, bv3)


def prepare_kernel_params(params, n_actions):
    """One-time transform to kernel-ready weights: fuse layer 1, pad narrow
    output dims to 128 lanes, cast weights to bf16 (biases stay f32)."""
    (wp1, bp1, wp2, bp2, wp3, bp3,
     wv1, bv1, wv2, bv2, wv3, bv3) = params

    a_pad = max(LANE, pl.cdiv(n_actions, LANE) * LANE)

    w1 = jnp.concatenate([wp1, wv1], axis=-1)          # [S, 2*HIDDEN]
    b1 = jnp.concatenate([bp1, bv1], axis=-1)          # [1, 2*HIDDEN]

    wp3_p = _pad_last(wp3, a_pad)
    bp3_p = _pad_last(bp3, a_pad)
    wv3_p = _pad_last(wv3, LANE)
    bv3_p = _pad_last(bv3, LANE)

    bf = lambda a: a.astype(jnp.bfloat16)
    return (bf(w1), b1,
            bf(wp2), bp2, bf(wp3_p), bp3_p,
            bf(wv2), bv2, bf(wv3_p), bv3_p)


def actor_critic_forward(x, kparams, n_actions):
    """Returns (probs [B, n_actions], value [B, 1])."""
    B, S = x.shape
    (w1, b1, wp2, bp2, wp3, bp3, wv2, bv2, wv3, bv3) = kparams
    a_pad = wp3.shape[-1]

    # Batch tiling: weights stay VMEM-resident (constant index_map), only the
    # x / probs / value tiles stream.  For large B the grid axis is sharded
    # across TensorCores ("parallel") and double-buffered by BlockSpec.
    TB = B if B <= 256 else 256
    grid = (pl.cdiv(B, TB),)

    wspec = lambda a: pl.BlockSpec(a.shape, lambda i: (0, 0))
    weights = (w1, b1, wp2, bp2, wp3, bp3, wv2, bv2, wv3, bv3)

    in_specs = [pl.BlockSpec((TB, S), lambda i: (i, 0))] + [wspec(a) for a in weights]
    out_specs = (pl.BlockSpec((TB, a_pad), lambda i: (i, 0)),
                 pl.BlockSpec((TB, LANE), lambda i: (i, 0)))

    probs_pad, value_pad = pl.pallas_call(
        functools.partial(_actor_critic_kernel, n_actions),
        out_shape=(jax.ShapeDtypeStruct((B, a_pad), jnp.float32),
                   jax.ShapeDtypeStruct((B, LANE), jnp.float32)),
        grid=grid,
        in_specs=in_specs,
        out_specs=out_specs,
        compiler_params=pltpu.CompilerParams(
            dimension_semantics=("parallel",)),
    )(x, *weights)

    return probs_pad[:, :n_actions], value_pad[:, :1]


def reference_forward(x, params, n_actions):
    (wp1, bp1, wp2, bp2, wp3, bp3,
     wv1, bv1, wv2, bv2, wv3, bv3) = params
    h = jnp.tanh(x @ wp1 + bp1)
    h = jnp.tanh(h @ wp2 + bp2)
    probs = jax.nn.softmax(h @ wp3 + bp3, axis=-1)
    v = jnp.tanh(x @ wv1 + bv1)
    v = jnp.tanh(v @ wv2 + bv2)
    value = v @ wv3 + bv3
    return probs, value


if __name__ == "__main__":
    B = 8
    STATE_SIZE = 32
    N_ACTIONS = 6
    SEED = 0

    key = jax.random.PRNGKey(SEED)
    k_param, k_x = jax.random.split(key)

    params = init_params(k_param, STATE_SIZE, N_ACTIONS)
    kparams = prepare_kernel_params(params, N_ACTIONS)   # fused/padded/bf16, once
    x = jax.random.normal(k_x, (B, STATE_SIZE), jnp.float32)

    probs, value = actor_critic_forward(x, kparams, N_ACTIONS)
    probs = jax.block_until_ready(probs)
    value = jax.block_until_ready(value)

    probs_ref, value_ref = reference_forward(x, params, N_ACTIONS)
    assert probs.shape == (B, N_ACTIONS) and value.shape == (B, 1)
    # bf16 matmul operands -> relaxed tolerances vs. the f32 reference
    assert jnp.allclose(probs, probs_ref, atol=2e-2, rtol=2e-2), \
        float(jnp.max(jnp.abs(probs - probs_ref)))
    assert jnp.allclose(value, value_ref, atol=2e-2, rtol=2e-2), \
        float(jnp.max(jnp.abs(value - value_ref)))
    assert jnp.allclose(jnp.sum(probs, axis=-1), 1.0, atol=1e-2)

    # TODO(synk): Categorical sampling / log_prob / entropy in act()/eval() are
    # host-side distribution glue over the kernel's probs output; not kernelized.
    print("KERNEL_OK")
</pallas_src>

<mosaic_0001>
module attributes {stable_mosaic.version = 11 : i64} {
  func.func @_actor_critic_kernel(%arg0: i32, %arg1: memref<8x32xf32, #tpu.memory_space<vmem>>, %arg2: memref<32x512xbf16, #tpu.memory_space<vmem>>, %arg3: memref<1x512xf32, #tpu.memory_space<vmem>>, %arg4: memref<256x256xbf16, #tpu.memory_space<vmem>>, %arg5: memref<1x256xf32, #tpu.memory_space<vmem>>, %arg6: memref<256x128xbf16, #tpu.memory_space<vmem>>, %arg7: memref<1x128xf32, #tpu.memory_space<vmem>>, %arg8: memref<256x256xbf16, #tpu.memory_space<vmem>>, %arg9: memref<1x256xf32, #tpu.memory_space<vmem>>, %arg10: memref<256x128xbf16, #tpu.memory_space<vmem>>, %arg11: memref<1x128xf32, #tpu.memory_space<vmem>>, %arg12: memref<8x128xf32, #tpu.memory_space<vmem>>, %arg13: memref<8x128xf32, #tpu.memory_space<vmem>>) attributes {dimension_semantics = [#tpu.dimension_semantics<parallel>], iteration_bounds = array<i64: 1>, scalar_prefetch = 0 : i64, scratch_operands = 0 : i64, tpu.core_type = #tpu.core_type<tc>, window_params = [{transform_indices = @transform_0, window_bounds = array<i64: 8, 32>}, {pipeline_mode = #tpu.pipeline_mode<synchronous>, transform_indices = @transform_1, window_bounds = array<i64: 32, 512>}, {pipeline_mode = #tpu.pipeline_mode<synchronous>, transform_indices = @transform_2, window_bounds = array<i64: 1, 512>}, {pipeline_mode = #tpu.pipeline_mode<synchronous>, transform_indices = @transform_3, window_bounds = array<i64: 256, 256>}, {pipeline_mode = #tpu.pipeline_mode<synchronous>, transform_indices = @transform_4, window_bounds = array<i64: 1, 256>}, {pipeline_mode = #tpu.pipeline_mode<synchronous>, transform_indices = @transform_5, window_bounds = array<i64: 256, 128>}, {pipeline_mode = #tpu.pipeline_mode<synchronous>, transform_indices = @transform_6, window_bounds = array<i64: 1, 128>}, {pipeline_mode = #tpu.pipeline_mode<synchronous>, transform_indices = @transform_7, window_bounds = array<i64: 256, 256>}, {pipeline_mode = #tpu.pipeline_mode<synchronous>, transform_indices = @transform_8, window_bounds = array<i64: 1, 256>}, {pipeline_mode = #tpu.pipeline_mode<synchronous>, transform_indices = @transform_9, window_bounds = array<i64: 256, 128>}, {pipeline_mode = #tpu.pipeline_mode<synchronous>, transform_indices = @transform_10, window_bounds = array<i64: 1, 128>}, {transform_indices = @transform_11, window_bounds = array<i64: 8, 128>}, {transform_indices = @transform_12, window_bounds = array<i64: 8, 128>}]} {
    %c0 = arith.constant 0 : index
    %c0_0 = arith.constant 0 : index
    %0 = vector.load %arg1[%c0, %c0_0] : memref<8x32xf32, #tpu.memory_space<vmem>>, vector<8x32xf32>
    %1 = arith.truncf %0 : vector<8x32xf32> to vector<8x32xbf16>
    %c0_1 = arith.constant 0 : index
    %c0_2 = arith.constant 0 : index
    %2 = vector.load %arg2[%c0_1, %c0_2] : memref<32x512xbf16, #tpu.memory_space<vmem>>, vector<32x512xbf16>
    %cst = arith.constant dense<0.000000e+00> : vector<8x512xf32>
    %3 = tpu.matmul %1, %2, %cst {dimension_numbers = #tpu.dot_dimension_numbers<[1], [0], [0], [1], [0, 0, 1, 1], [], []>} : vector<8x32xbf16>, vector<32x512xbf16>, vector<8x512xf32> -> vector<8x512xf32>
    %c0_3 = arith.constant 0 : index
    %c0_4 = arith.constant 0 : index
    %4 = vector.load %arg3[%c0_3, %c0_4] : memref<1x512xf32, #tpu.memory_space<vmem>>, vector<1x512xf32>
    %5 = vector.broadcast %4 : vector<1x512xf32> to vector<8x512xf32>
    %6 = arith.addf %3, %5 : vector<8x512xf32>
    %7 = math.tanh %6 : vector<8x512xf32>
    %8 = vector.extract_strided_slice %7 {offsets = [0, 0], sizes = [8, 256], strides = [1, 1]} : vector<8x512xf32> to vector<8x256xf32>
    %9 = vector.extract_strided_slice %7 {offsets = [0, 256], sizes = [8, 256], strides = [1, 1]} : vector<8x512xf32> to vector<8x256xf32>
    %10 = arith.truncf %8 : vector<8x256xf32> to vector<8x256xbf16>
    %c0_5 = arith.constant 0 : index
    %c0_6 = arith.constant 0 : index
    %11 = vector.load %arg4[%c0_5, %c0_6] : memref<256x256xbf16, #tpu.memory_space<vmem>>, vector<256x256xbf16>
    %cst_7 = arith.constant dense<0.000000e+00> : vector<8x256xf32>
    %12 = tpu.matmul %10, %11, %cst_7 {dimension_numbers = #tpu.dot_dimension_numbers<[1], [0], [0], [1], [0, 0, 1, 1], [], []>} : vector<8x256xbf16>, vector<256x256xbf16>, vector<8x256xf32> -> vector<8x256xf32>
    %c0_8 = arith.constant 0 : index
    %c0_9 = arith.constant 0 : index
    %13 = vector.load %arg5[%c0_8, %c0_9] : memref<1x256xf32, #tpu.memory_space<vmem>>, vector<1x256xf32>
    %14 = vector.broadcast %13 : vector<1x256xf32> to vector<8x256xf32>
    %15 = arith.addf %12, %14 : vector<8x256xf32>
    %16 = math.tanh %15 : vector<8x256xf32>
    %17 = arith.truncf %16 : vector<8x256xf32> to vector<8x256xbf16>
    %c0_10 = arith.constant 0 : index
    %c0_11 = arith.constant 0 : index
    %18 = vector.load %arg6[%c0_10, %c0_11] : memref<256x128xbf16, #tpu.memory_space<vmem>>, vector<256x128xbf16>
    %cst_12 = arith.constant dense<0.000000e+00> : vector<8x128xf32>
    %19 = tpu.matmul %17, %18, %cst_12 {dimension_numbers = #tpu.dot_dimension_numbers<[1], [0], [0], [1], [0, 0, 1, 1], [], []>} : vector<8x256xbf16>, vector<256x128xbf16>, vector<8x128xf32> -> vector<8x128xf32>
    %c0_13 = arith.constant 0 : index
    %c0_14 = arith.constant 0 : index
    %20 = vector.load %arg7[%c0_13, %c0_14] : memref<1x128xf32, #tpu.memory_space<vmem>>, vector<1x128xf32>
    %21 = vector.broadcast %20 : vector<1x128xf32> to vector<8x128xf32>
    %22 = arith.addf %19, %21 : vector<8x128xf32>
    %23 = tpu.iota {dimensions = array<i32: 1>} : vector<8x128xi32>
    %c6_i32 = arith.constant 6 : i32
    %24 = vector.broadcast %c6_i32 : i32 to vector<8x128xi32>
    %25 = arith.cmpi slt, %23, %24 : vector<8x128xi32>
    %cst_15 = arith.constant 0xFF800000 : f32
    %26 = vector.broadcast %cst_15 : f32 to vector<8x128xf32>
    %27 = arith.select %25, %22, %26 : vector<8x128xi1>, vector<8x128xf32>
    %cst_16 = arith.constant dense<0xFF800000> : vector<8xf32>
    %28 = vector.multi_reduction <maximumf>, %27, %cst_16 [1] : vector<8x128xf32> to vector<8xf32>
    %29 = vector.shape_cast %28 : vector<8xf32> to vector<8x1xf32>
    %30 = vector.broadcast %29 : vector<8x1xf32> to vector<8x128xf32>
    %31 = arith.subf %27, %30 : vector<8x128xf32>
    %32 = math.exp %31 : vector<8x128xf32>
    %cst_17 = arith.constant dense<0.000000e+00> : vector<8xf32>
    %33 = vector.multi_reduction <add>, %32, %cst_17 [1] : vector<8x128xf32> to vector<8xf32>
    %34 = vector.shape_cast %33 : vector<8xf32> to vector<8x1xf32>
    %35 = tpu.reciprocal %34 {approx = true} : vector<8x1xf32> -> vector<8x1xf32>
    %36 = vector.broadcast %35 : vector<8x1xf32> to vector<8x128xf32>
    %37 = arith.mulf %32, %36 : vector<8x128xf32>
    %c0_18 = arith.constant 0 : index
    %c0_19 = arith.constant 0 : index
    %38 = vector.load %arg12[%c0_18, %c0_19] : memref<8x128xf32, #tpu.memory_space<vmem>>, vector<8x128xf32>
    tpu.vector_store %arg12[%c0_18, %c0_19], %37 {strides = array<i32>} : memref<8x128xf32, #tpu.memory_space<vmem>>, vector<8x128xf32>,
    %39 = arith.truncf %9 : vector<8x256xf32> to vector<8x256xbf16>
    %c0_20 = arith.constant 0 : index
    %c0_21 = arith.constant 0 : index
    %40 = vector.load %arg8[%c0_20, %c0_21] : memref<256x256xbf16, #tpu.memory_space<vmem>>, vector<256x256xbf16>
    %cst_22 = arith.constant dense<0.000000e+00> : vector<8x256xf32>
    %41 = tpu.matmul %39, %40, %cst_22 {dimension_numbers = #tpu.dot_dimension_numbers<[1], [0], [0], [1], [0, 0, 1, 1], [], []>} : vector<8x256xbf16>, vector<256x256xbf16>, vector<8x256xf32> -> vector<8x256xf32>
    %c0_23 = arith.constant 0 : index
    %c0_24 = arith.constant 0 : index
    %42 = vector.load %arg9[%c0_23, %c0_24] : memref<1x256xf32, #tpu.memory_space<vmem>>, vector<1x256xf32>
    %43 = vector.broadcast %42 : vector<1x256xf32> to vector<8x256xf32>
    %44 = arith.addf %41, %43 : vector<8x256xf32>
    %45 = math.tanh %44 : vector<8x256xf32>
    %46 = arith.truncf %45 : vector<8x256xf32> to vector<8x256xbf16>
    %c0_25 = arith.constant 0 : index
    %c0_26 = arith.constant 0 : index
    %47 = vector.load %arg10[%c0_25, %c0_26] : memref<256x128xbf16, #tpu.memory_space<vmem>>, vector<256x128xbf16>
    %cst_27 = arith.constant dense<0.000000e+00> : vector<8x128xf32>
    %48 = tpu.matmul %46, %47, %cst_27 {dimension_numbers = #tpu.dot_dimension_numbers<[1], [0], [0], [1], [0, 0, 1, 1], [], []>} : vector<8x256xbf16>, vector<256x128xbf16>, vector<8x128xf32> -> vector<8x128xf32>
    %c0_28 = arith.constant 0 : index
    %c0_29 = arith.constant 0 : index
    %49 = vector.load %arg11[%c0_28, %c0_29] : memref<1x128xf32, #tpu.memory_space<vmem>>, vector<1x128xf32>
    %50 = vector.broadcast %49 : vector<1x128xf32> to vector<8x128xf32>
    %51 = arith.addf %48, %50 : vector<8x128xf32>
    %c0_30 = arith.constant 0 : index
    %c0_31 = arith.constant 0 : index
    %52 = vector.load %arg13[%c0_30, %c0_31] : memref<8x128xf32, #tpu.memory_space<vmem>>, vector<8x128xf32>
    tpu.vector_store %arg13[%c0_30, %c0_31], %51 {strides = array<i32>} : memref<8x128xf32, #tpu.memory_space<vmem>>, vector<8x128xf32>,
    return
  }
  func.func @transform_0(%arg0: i32) -> (i32, i32) {
    %c0_i32 = arith.constant 0 : i32
    %c0_i32_0 = arith.constant 0 : i32
    return %arg0, %c0_i32 : i32, i32
  }
  func.func @transform_1(%arg0: i32) -> (i32, i32) {
    %c0_i32 = arith.constant 0 : i32
    %c0_i32_0 = arith.constant 0 : i32
    %c0_i32_1 = arith.constant 0 : i32
    return %c0_i32, %c0_i32_0 : i32, i32
  }
  func.func @transform_2(%arg0: i32) -> (i32, i32) {
    %c0_i32 = arith.constant 0 : i32
    %c0_i32_0 = arith.constant 0 : i32
    %c0_i32_1 = arith.constant 0 : i32
    return %c0_i32, %c0_i32_0 : i32, i32
  }
  func.func @transform_3(%arg0: i32) -> (i32, i32) {
    %c0_i32 = arith.constant 0 : i32
    %c0_i32_0 = arith.constant 0 : i32
    %c0_i32_1 = arith.constant 0 : i32
    return %c0_i32, %c0_i32_0 : i32, i32
  }
  func.func @transform_4(%arg0: i32) -> (i32, i32) {
    %c0_i32 = arith.constant 0 : i32
    %c0_i32_0 = arith.constant 0 : i32
    %c0_i32_1 = arith.constant 0 : i32
    return %c0_i32, %c0_i32_0 : i32, i32
  }
  func.func @transform_5(%arg0: i32) -> (i32, i32) {
    %c0_i32 = arith.constant 0 : i32
    %c0_i32_0 = arith.constant 0 : i32
    %c0_i32_1 = arith.constant 0 : i32
    return %c0_i32, %c0_i32_0 : i32, i32
  }
  func.func @transform_6(%arg0: i32) -> (i32, i32) {
    %c0_i32 = arith.constant 0 : i32
    %c0_i32_0 = arith.constant 0 : i32
    %c0_i32_1 = arith.constant 0 : i32
    return %c0_i32, %c0_i32_0 : i32, i32
  }
  func.func @transform_7(%arg0: i32) -> (i32, i32) {
    %c0_i32 = arith.constant 0 : i32
    %c0_i32_0 = arith.constant 0 : i32
    %c0_i32_1 = arith.constant 0 : i32
    return %c0_i32, %c0_i32_0 : i32, i32
  }
  func.func @transform_8(%arg0: i32) -> (i32, i32) {
    %c0_i32 = arith.constant 0 : i32
    %c0_i32_0 = arith.constant 0 : i32
    %c0_i32_1 = arith.constant 0 : i32
    return %c0_i32, %c0_i32_0 : i32, i32
  }
  func.func @transform_9(%arg0: i32) -> (i32, i32) {
    %c0_i32 = arith.constant 0 : i32
    %c0_i32_0 = arith.constant 0 : i32
    %c0_i32_1 = arith.constant 0 : i32
    return %c0_i32, %c0_i32_0 : i32, i32
  }
  func.func @transform_10(%arg0: i32) -> (i32, i32) {
    %c0_i32 = arith.constant 0 : i32
    %c0_i32_0 = arith.constant 0 : i32
    %c0_i32_1 = arith.constant 0 : i32
    return %c0_i32, %c0_i32_0 : i32, i32
  }
  func.func @transform_11(%arg0: i32) -> (i32, i32) {
    %c0_i32 = arith.constant 0 : i32
    %c0_i32_0 = arith.constant 0 : i32
    return %arg0, %c0_i32 : i32, i32
  }
  func.func @transform_12(%arg0: i32) -> (i32, i32) {
    %c0_i32 = arith.constant 0 : i32
    %c0_i32_0 = arith.constant 0 : i32
    return %arg0, %c0_i32 : i32, i32
  }
}

</mosaic_0001>

<bundles_post_ra>
// kernel: tpu_custom_call.1
= control target key start
LH: loop header
LB: loop body
LE: loop exit
PB: predicated region body
PF: predicated region fallthrough
CT: control target
= control target key end

     0   :  { %18 = vsyncpa [#allocation3], 0  ;;  %s1868_s0 = inlined_call_operand.hbm [shape: f32[8,32], index: 0, kind: input, shape index: {}]   ;;  %s1869_s1 = inlined_call_operand.hbm [shape: bf16[32,512], index: 1, kind: input, shape index: {}]   ;;  %s1870_s2 = inlined_call_operand.hbm [shape: f32[1,512], index: 2, kind: input, shape index: {}]   ;;  %s1871_s3 = inlined_call_operand.hbm [shape: bf16[256,256], index: 3, kind: input, shape index: {}]   ;;  %s1872_s4 = inlined_call_operand.vmem [shape: f32[1,256], index: 4, kind: input, shape index: {}]   ;;  %s1873_s5 = inlined_call_operand.hbm [shape: bf16[256,128], index: 5, kind: input, shape index: {}]   ;;  %s1874_s6 = inlined_call_operand.vmem [shape: f32[1,128], index: 6, kind: input, shape index: {}]   ;;  %s1875_s7 = inlined_call_operand.hbm [shape: bf16[256,256], index: 7, kind: input, shape index: {}]   ;;  %s1876_s8 = inlined_call_operand.vmem [shape: f32[1,256], index: 8, kind: input, shape index: {}]   ;;  %s1877_s9 = inlined_call_operand.hbm [shape: bf16[256,128], index: 9, kind: input, shape index: {}]   ;;  %s1878_s10 = inlined_call_operand.vmem [shape: f32[1,128], index: 10, kind: input, shape index: {}]   ;;  %s1879_s11 = inlined_call_operand.hbm [shape: f32[8,128], index: 11, kind: output, shape index: {0}]   ;;  %s1880_s12 = inlined_call_operand.hbm [shape: f32[8,128], index: 12, kind: output, shape index: {1}]  }
   0x1   :  { %19 = vsyncpa [#allocation6], 0 }
   0x2   :  { %20 = vsyncpa [#allocation9], 0 }
   0x3   :  { %21 = vsyncpa [#allocation12], 0 }
   0x4   :  { %22 = vsyncpa [#allocation4], 0 }
   0x5   :  { %23 = vsyncpa [#allocation16], 0  ;;  %s1715_s21 = smov [#allocation5]  }
   0x6   :  { %s39_s22 = sshll.u32 %s1715_s21, 4  ;;  %s40_s22 = int_to_ptr.vmem [resolvable:$true] %s39_s22 }
   0x7   :  { %s1531_s23 = scalar_lea.vmem %s40_s22, 1024  ;;  %p1536_p1 = scmp.lt.s32.totalorder %s40_s22, %s40_s22 }
   0x8   :  { %p1532_p0 = scmp.ne.s32.totalorder %s40_s22, %s1531_s23  ;;  %p1537_p2 = scmp.lt.s32.totalorder %s1531_s23, %s1531_s23 }
   0xa   :  { %p1538_p3 = por %p1537_p2, %p1536_p1 }
   0xc   :  { %p1539_p4 = pnand %p1538_p3, %p1532_p0 }
   0xe   :  { %1542 = shalt.err (!%p1539_p4)
}
   0xf   :  { %s1716_s24 = smov 256   ;;  %s1717_s25 = smov 16  }
  0x10   :  { %45 = dma.hbm_to_vmem [thread:$0]  %s1869_s1, 1024, %s40_s22, [#allocation6], %s1716_s24, %s1716_s24, %s1717_s25  }
  0x11   :  { %s1718_s28 = smov [#allocation8]  }
  0x12   :  { %s61_s29 = sshll.u32 %s1718_s28, 4  ;;  %s62_s29 = int_to_ptr.vmem [resolvable:$true] %s61_s29 }
  0x13   :  { %s1551_s30 = scalar_lea.vmem %s62_s29, 4096  ;;  %p1556_p6 = scmp.lt.s32.totalorder %s62_s29, %s62_s29 }
  0x14   :  { %p1552_p5 = scmp.ne.s32.totalorder %s62_s29, %s1551_s30  ;;  %p1557_p7 = scmp.lt.s32.totalorder %s1551_s30, %s1551_s30 }
  0x16   :  { %p1558_p8 = por %p1557_p7, %p1556_p6 }
  0x18   :  { %p1559_p9 = pnand %p1558_p8, %p1552_p5 }
  0x1a   :  { %1562 = shalt.err (!%p1559_p9)
}
  0x1b   :  { %s1719_s13 = smov 128   ;;  %s1720_s14 = smov 8  }
  0x1c   :  { %67 = dma.hbm_to_vmem [thread:$0]  %s1871_s3, 4096, %s62_s29, [#allocation9], %s1719_s13, %s1719_s13, %s1720_s14  }
  0x1d   :  { %s1721_s17 = smov [#allocation11]   ;;  %s1722_s19 = smov [#allocation2]  }
  0x1e   :  { %s89_s18 = sshll.u32 %s1721_s17, 4  ;;  %s30_s1 = sshll.u32 %s1722_s19, 4  ;;  %s90_s18 = int_to_ptr.vmem [resolvable:$true] %s89_s18  ;;  %s31_s1 = int_to_ptr.vmem [resolvable:$true] %s30_s1 }
  0x1f   :  { %s1571_s20 = scalar_lea.vmem %s90_s18, 4096  ;;  %p1576_p11 = scmp.lt.s32.totalorder %s90_s18, %s90_s18 }
  0x20   :  { %p1572_p10 = scmp.ne.s32.totalorder %s90_s18, %s1571_s20  ;;  %p1577_p12 = scmp.lt.s32.totalorder %s1571_s20, %s1571_s20 }
  0x22   :  { %p1578_p13 = por %p1577_p12, %p1576_p11 }
  0x24   :  { %p1579_p0 = pnand %p1578_p13, %p1572_p10 }
  0x26   :  { %1582 = shalt.err (!%p1579_p0)
}
  0x27   :  { %95 = dma.hbm_to_vmem [thread:$0]  %s1875_s7, 4096, %s90_s18, [#allocation12], %s1719_s13, %s1719_s13, %s1720_s14  }
  0x28   :  { %s1591_s23 = scalar_lea.vmem %s31_s1, 128  ;;  %p1596_p2 = scmp.lt.s32.totalorder %s31_s1, %s31_s1 }
  0x29   :  { %p1592_p1 = scmp.ne.s32.totalorder %s31_s1, %s1591_s23  ;;  %p1597_p3 = scmp.lt.s32.totalorder %s1591_s23, %s1591_s23 }
  0x2b   :  { %p1598_p4 = por %p1597_p3, %p1596_p2 }
  0x2d   :  { %p1599_p5 = pnand %p1598_p4, %p1592_p1 }
  0x2f   :  { %1602 = shalt.err (!%p1599_p5)
}
  0x30   :  { %33 = dma.hbm_to_vmem [thread:$0]  %s1868_s0, 128, %s31_s1, [#allocation3]  }
  0x31   :  { %s1723_s25 = smov [#allocation7]   ;;  %s1724_s27 = smov [#allocation10]  }
  0x32   :  { %s52_s26 = sshll.u32 %s1723_s25, 4  ;;  %s75_s28 = sshll.u32 %s1724_s27, 4  ;;  %s53_s26 = int_to_ptr.vmem [resolvable:$true] %s52_s26  ;;  %s76_s28 = int_to_ptr.vmem [resolvable:$true] %s75_s28 }
  0x33   :  { %s1611_s29 = scalar_lea.vmem %s53_s26, 64  ;;  %p1616_p7 = scmp.lt.s32.totalorder %s53_s26, %s53_s26 }
  0x34   :  { %p1612_p6 = scmp.ne.s32.totalorder %s53_s26, %s1611_s29  ;;  %p1617_p8 = scmp.lt.s32.totalorder %s1611_s29, %s1611_s29 }
  0x36   :  { %p1618_p9 = por %p1617_p8, %p1616_p7 }
  0x38   :  { %p1619_p10 = pnand %p1618_p9, %p1612_p6 }
  0x3a   :  { %1622 = shalt.err (!%p1619_p10)
}
  0x3b   :  { %55 = dma.hbm_to_vmem [thread:$0]  %s1870_s2, 64, %s53_s26, [#allocation6]  }
  0x3c   :  { %s1631_s13 = scalar_lea.vmem %s76_s28, 2048  ;;  %p1636_p12 = scmp.lt.s32.totalorder %s76_s28, %s76_s28 }
  0x3d   :  { %p1632_p11 = scmp.ne.s32.totalorder %s76_s28, %s1631_s13  ;;  %p1637_p13 = scmp.lt.s32.totalorder %s1631_s13, %s1631_s13 }
  0x3f   :  { %p1638_p0 = por %p1637_p13, %p1636_p12 }
  0x41   :  { %p1639_p1 = pnand %p1638_p0, %p1632_p11 }
  0x43   :  { %1642 = shalt.err (!%p1639_p1)
}
  0x44   :  { %s1725_s0 = smov 64   ;;  %s1726_s14 = smov 4  }
  0x45   :  { %81 = dma.hbm_to_vmem [thread:$0]  %s1873_s5, 2048, %s76_s28, [#allocation9], %s1725_s0, %s1725_s0, %s1726_s14  }
  0x46   :  { %s1727_s17 = smov [#allocation13]  }
  0x47   :  { %s103_s18 = sshll.u32 %s1727_s17, 4  ;;  %s104_s18 = int_to_ptr.vmem [resolvable:$true] %s103_s18 }
  0x48   :  { %s1651_s19 = scalar_lea.vmem %s104_s18, 2048  ;;  %p1656_p3 = scmp.lt.s32.totalorder %s104_s18, %s104_s18 }
  0x49   :  { %p1652_p2 = scmp.ne.s32.totalorder %s104_s18, %s1651_s19  ;;  %p1657_p4 = scmp.lt.s32.totalorder %s1651_s19, %s1651_s19 }
  0x4b   :  { %p1658_p5 = por %p1657_p4, %p1656_p3 }
  0x4d   :  { %p1659_p6 = pnand %p1658_p5, %p1652_p2 }
  0x4f   :  { %1662 = shalt.err (!%p1659_p6)
}
  0x50   :  { %109 = dma.hbm_to_vmem [thread:$0]  %s1877_s9, 2048, %s104_s18, [#allocation12], %s1725_s0, %s1725_s0, %s1726_s14  }
  0x51   :  { %1703 = dma.done.wait [#allocation3], 128  }
  0x52   :  { %1704 = vsyncadd [#allocation3], 4294967168 }
  0x53   :  { %1705 = dma.done.wait [#allocation6], 1088  }
  0x54   :  { %1706 = vsyncadd [#allocation6], 4294966208 }
  0x55   :  { %1707 = dma.done.wait [#allocation9], 6144  }
  0x56   :  { %1708 = vsyncadd [#allocation9], 4294961152 }
  0x57   :  { %1709 = dma.done.wait [#allocation12], 6144  }
  0x58   :  { %1710 = vsyncadd [#allocation12], 4294961152  ;;  %v1728_v0 = vmov 0   ;;  %v1363_v1 = vld [vmem:[#allocation5 + $0x24] ss:$16 sps:$4 sm:$0xff]   ;;  %v134_v5 = vld [vmem:[#allocation2] sm:$0xff]  ;;  %v146_v49 = vlaneseq }
  0x59   :  { %242 = vmatprep.mubr.bf16.mxu0 %v1728_v0  ;;  %283 = vmatprep.mubr.bf16.mxu1 %v1728_v0  ;;  %v1365_v2 = vld [vmem:[#allocation5 + $0x20] ss:$16 sps:$4 sm:$0xff]   ;;  %v1366_v3 = vld [vmem:[#allocation5 + $0x4] ss:$16 sps:$4 sm:$0xff]   ;;  %v1817_v7 = vpack.c.bf16 %v134_v5, %v134_v5  ;;  %vm206_vm0 = vcmask 261120   ;;  %s1729_s23 = smov [#allocation15]  }
  0x5a   :  { %222 = vmatprep.subr.bf16.mxu0 %v1363_v1  ;;  %v1368_v4 = vld [vmem:[#allocation5] ss:$16 sps:$4 sm:$0xff]   ;;  %v1369_v8 = vld [vmem:[#allocation8 + $0x70] ss:$8 sps:$4 sm:$0xff]   ;;  %v1372_v10 = vld [vmem:[#allocation8 + $0x60] ss:$8 sps:$4 sm:$0xff]  }
  0x5b   :  { %223 = vmatpush1.bf16.msra.mxu0 %v1365_v2  ;;  %v1371_v6 = vld [vmem:[#allocation8 + $0x74] ss:$8 sps:$4 sm:$0xff]   ;;  %v1374_v9 = vld [vmem:[#allocation8 + $0x64] ss:$8 sps:$4 sm:$0xff]   ;;  %v1375_v12 = vld [vmem:[#allocation8 + $0x50] ss:$8 sps:$4 sm:$0xff]  }
  0x5c   :  { %224 = vmatprep.subr.bf16.mxu0 %v1366_v3  ;;  %v1377_v11 = vld [vmem:[#allocation8 + $0x54] ss:$8 sps:$4 sm:$0xff]   ;;  %v1380_v13 = vld [vmem:[#allocation8 + $0x44] ss:$8 sps:$4 sm:$0xff]   ;;  %v1378_v14 = vld [vmem:[#allocation8 + $0x40] ss:$8 sps:$4 sm:$0xff]  }
  0x5d   :  { %v1383_v15 = vld [vmem:[#allocation8 + $0x34] ss:$8 sps:$4 sm:$0xff]   ;;  %v1381_v16 = vld [vmem:[#allocation8 + $0x30] ss:$8 sps:$4 sm:$0xff]   ;;  %v1386_v17 = vld [vmem:[#allocation8 + $0x24] ss:$8 sps:$4 sm:$0xff]  }
  0x5e   :  { %v1384_v18 = vld [vmem:[#allocation8 + $0x20] ss:$8 sps:$4 sm:$0xff]   ;;  %v1389_v19 = vld [vmem:[#allocation8 + $0x14] ss:$8 sps:$4 sm:$0xff]   ;;  %v1387_v20 = vld [vmem:[#allocation8 + $0x10] ss:$8 sps:$4 sm:$0xff]  }
  0x5f   :  { %225 = vmatpush1.bf16.msra.mxu0 %v1368_v4  ;;  %v1392_v21 = vld [vmem:[#allocation8 + $0x4] ss:$8 sps:$4 sm:$0xff]   ;;  %v1390_v22 = vld [vmem:[#allocation8] ss:$8 sps:$4 sm:$0xff]   ;;  %v1395_v23 = vld [vmem:[#allocation8 + $0xf4] ss:$8 sps:$4 sm:$0xff]  }
  0x60   :  { %502 = vmatprep.subr.bf16.mxu0 %v1371_v6  ;;  %v1393_v24 = vld [vmem:[#allocation8 + $0xf0] ss:$8 sps:$4 sm:$0xff]   ;;  %v1398_v25 = vld [vmem:[#allocation8 + $0xe4] ss:$8 sps:$4 sm:$0xff]   ;;  %v1396_v26 = vld [vmem:[#allocation8 + $0xe0] ss:$8 sps:$4 sm:$0xff]  }
  0x61   :  { %v1401_v27 = vld [vmem:[#allocation8 + $0xd4] ss:$8 sps:$4 sm:$0xff]   ;;  %v1399_v28 = vld [vmem:[#allocation8 + $0xd0] ss:$8 sps:$4 sm:$0xff]   ;;  %v1404_v29 = vld [vmem:[#allocation8 + $0xc4] ss:$8 sps:$4 sm:$0xff]  }
  0x62   :  { %1203 = vmatmul.mubr.msk.bf16.vlgmr.msra.gmra.mxu0 %vm206_vm0, %v1817_v7  ;;  %v1402_v30 = vld [vmem:[#allocation8 + $0xc0] ss:$8 sps:$4 sm:$0xff]   ;;  %v1407_v31 = vld [vmem:[#allocation8 + $0xb4] ss:$8 sps:$4 sm:$0xff]   ;;  %v1405_v32 = vld [vmem:[#allocation8 + $0xb0] ss:$8 sps:$4 sm:$0xff]  }
  0x63   :  { %503 = vmatpush1.bf16.msra.mxu0 %v1369_v8  ;;  %v1410_v33 = vld [vmem:[#allocation8 + $0xa4] ss:$8 sps:$4 sm:$0xff]   ;;  %v1408_v34 = vld [vmem:[#allocation8 + $0xa0] ss:$8 sps:$4 sm:$0xff]   ;;  %v1413_v35 = vld [vmem:[#allocation8 + $0x94] ss:$8 sps:$4 sm:$0xff]  }
  0x64   :  { %504 = vmatprep.subr.bf16.mxu0 %v1374_v9  ;;  %v1411_v36 = vld [vmem:[#allocation8 + $0x90] ss:$8 sps:$4 sm:$0xff]   ;;  %v1416_v37 = vld [vmem:[#allocation8 + $0x84] ss:$8 sps:$4 sm:$0xff]   ;;  %v1414_v38 = vld [vmem:[#allocation8 + $0x80] ss:$8 sps:$4 sm:$0xff]  }
  0x65   :  { %v1417_v39 = vld [vmem:[#allocation5 + $0x2c] ss:$16 sps:$4 sm:$0xff]   ;;  %v1419_v40 = vld [vmem:[#allocation5 + $0x28] ss:$16 sps:$4 sm:$0xff]   ;;  %v1824_v50 = vshrl.u32 %v146_v49, 7  ;;  %s1179_s3 = sshll.u32 %s1729_s23, 4  ;;  %s1180_s3 = int_to_ptr.vmem [resolvable:$true] %s1179_s3 }
  0x66   :  { %v1420_v41 = vld [vmem:[#allocation5 + $0xc] ss:$16 sps:$4 sm:$0xff]   ;;  %263 = vmatprep.subr.bf16.mxu1 %v1417_v39  ;;  %v1422_v42 = vld [vmem:[#allocation5 + $0x8] ss:$16 sps:$4 sm:$0xff]   ;;  %v1829_v52 = vld [vmem:[#allocation7] sm:$0xf]  ;;  %p1668_p8 = scmp.lt.s32.totalorder %s1180_s3, %s1180_s3 }
  0x67   :  { %505 = vmatpush1.bf16.msra.mxu0 %v1372_v10  ;;  %264 = vmatpush1.bf16.msra.mxu1 %v1419_v40  ;;  %v1423_v43 = vld [vmem:[#allocation10 + $0x78] sm:$0xff]   ;;  %v1425_v45 = vld [vmem:[#allocation10 + $0x70] sm:$0xff]   ;;  %v1427_v47 = vld [vmem:[#allocation10 + $0x68] sm:$0xff]   ;;  %v1827_v51 = vsub.s32 0, %v1824_v50  ;;  %v1832_v53 = vsub.s32 1, %v1824_v50  ;;  %s1663_s24 = scalar_lea.vmem %s1180_s3, 128 }
  0x68   :  { %506 = vmatprep.subr.bf16.mxu0 %v1377_v11  ;;  %265 = vmatprep.subr.bf16.mxu1 %v1420_v41  ;;  %v1424_v44 = vld [vmem:[#allocation10 + $0x38] sm:$0xff]   ;;  %v1426_v46 = vld [vmem:[#allocation10 + $0x30] sm:$0xff]   ;;  %v1428_v48 = vld [vmem:[#allocation10 + $0x28] sm:$0xff]   ;;  %p1664_p7 = scmp.ne.s32.totalorder %s1180_s3, %s1663_s24  ;;  %p1669_p9 = scmp.lt.s32.totalorder %s1663_s24, %s1663_s24 }
  0x69   :  { %v149_v54 = vrot.slane %v1829_v52, %v1827_v51  ;;  %v153_v55 = vrot.slane %v1829_v52, %v1832_v53  ;;  %v1429_v2 = vld [vmem:[#allocation10 + $0x60] sm:$0xff]   ;;  %v1431_v4 = vld [vmem:[#allocation10 + $0x58] sm:$0xff]   ;;  %v1433_v6 = vld [vmem:[#allocation10 + $0x50] sm:$0xff]  }
  0x6a   :  { %v1430_v3 = vld [vmem:[#allocation10 + $0x20] sm:$0xff]   ;;  %v1432_v5 = vld [vmem:[#allocation10 + $0x18] sm:$0xff]   ;;  %v1435_v8 = vld [vmem:[#allocation10 + $0x48] sm:$0xff]   ;;  %p1670_p10 = por %p1669_p9, %p1668_p8 }
  0x6b   :  { %507 = vmatpush1.bf16.msra.mxu0 %v1375_v12  ;;  %266 = vmatpush1.bf16.msra.mxu1 %v1422_v42  ;;  %v1436_v9 = vld [vmem:[#allocation10 + $0x8] sm:$0xff]   ;;  %v1437_v10 = vld [vmem:[#allocation10 + $0x40] sm:$0xff]   ;;  %v1441_v12 = vld [vmem:[#allocation11 + $0x74] ss:$8 sps:$4 sm:$0xff]  }
  0x6c   :  { %508 = vmatprep.subr.bf16.mxu0 %v1380_v13  ;;  %1303 = vmatprep.subr.bf16.mxu1 %v1423_v43  ;;  %v1438_v11 = vld [vmem:[#allocation10] sm:$0xff]   ;;  %v1445_v39 = vld [vmem:[#allocation11 + $0x50] ss:$8 sps:$4 sm:$0xff]   ;;  %v1453_v42 = vld [vmem:[#allocation11 + $0x34] ss:$8 sps:$4 sm:$0xff]   ;;  %p1671_p11 = pnand %p1670_p10, %p1664_p7 }
  0x6d   :  { %v1450_v40 = vld [vmem:[#allocation11 + $0x44] ss:$8 sps:$4 sm:$0xff]   ;;  %v1448_v41 = vld [vmem:[#allocation11 + $0x40] ss:$8 sps:$4 sm:$0xff]   ;;  %v1451_v43 = vld [vmem:[#allocation11 + $0x30] ss:$8 sps:$4 sm:$0xff]  }
  0x6e   :  { %1204 = vmatmul.mubr.msk.bf16.vlgmr.msra.gmra.mxu1 %vm206_vm0, %v1817_v7  ;;  %v1434_v7 = vld [vmem:[#allocation10 + $0x10] sm:$0xff]  }
  0x6f   :  { %509 = vmatpush1.bf16.msra.mxu0 %v1378_v14  ;;  %1304 = vmatpush3.bf16.msra.mxu1 %v1424_v44  ;;  %v1456_v44 = vld [vmem:[#allocation11 + $0x24] ss:$8 sps:$4 sm:$0xff]  }
  0x70   :  { %510 = vmatprep.subr.bf16.mxu0 %v1383_v15  ;;  %1305 = vmatprep.subr.bf16.mxu1 %v1425_v45  ;;  %v1454_v45 = vld [vmem:[#allocation11 + $0x20] ss:$8 sps:$4 sm:$0xff]  }
  0x73   :  { %511 = vmatpush1.bf16.msra.mxu0 %v1381_v16  ;;  %1306 = vmatpush3.bf16.msra.mxu1 %v1426_v46  ;;  %v1459_v46 = vld [vmem:[#allocation11 + $0x14] ss:$8 sps:$4 sm:$0xff]  }
  0x74   :  { %512 = vmatprep.subr.bf16.mxu0 %v1386_v17  ;;  %1307 = vmatprep.subr.bf16.mxu1 %v1427_v47  ;;  %v160_v17 = vsub.s32 3, %v1824_v50  ;;  %v1457_v47 = vld [vmem:[#allocation11 + $0x10] ss:$8 sps:$4 sm:$0xff]  }
  0x77   :  { %513 = vmatpush1.bf16.msra.mxu0 %v1384_v18  ;;  %1308 = vmatpush3.bf16.msra.mxu1 %v1428_v48  ;;  %v330_v18 = vld [vmem:[%s1872_s4] sm:$0x3]  ;;  %v1462_v48 = vld [vmem:[#allocation11 + $0x4] ss:$8 sps:$4 sm:$0xff]  }
  0x78   :  { %514 = vmatprep.subr.bf16.mxu0 %v1389_v19  ;;  %1309 = vmatprep.subr.bf16.mxu1 %v1429_v2  ;;  %v161_v19 = vrot.slane %v1829_v52, %v160_v17  ;;  %v1477_v2 = vld [vmem:[#allocation11 + $0xb4] ss:$8 sps:$4 sm:$0xff]   ;;  %v1494_v17 = vld [vmem:[#allocation13 + $0x20] sm:$0xff]  }
  0x7b   :  { %515 = vmatpush1.bf16.msra.mxu0 %v1387_v20  ;;  %1310 = vmatpush3.bf16.msra.mxu1 %v1430_v3  ;;  %v335_v20 = vrot.slane %v330_v18, %v1827_v51  ;;  %v1475_v3 = vld [vmem:[#allocation11 + $0xb0] ss:$8 sps:$4 sm:$0xff]  }
  0x7c   :  { %516 = vmatprep.subr.bf16.mxu0 %v1392_v21  ;;  %1311 = vmatprep.subr.bf16.mxu1 %v1431_v4  ;;  %v339_v21 = vrot.slane %v330_v18, %v1832_v53  ;;  %v1478_v4 = vld [vmem:[#allocation11 + $0xa0] ss:$8 sps:$4 sm:$0xff]   ;;  %v1495_v18 = vld [vmem:[#allocation13 + $0x58] sm:$0xff]  }
  0x7f   :  { %517 = vmatpush1.bf16.msra.mxu0 %v1390_v22  ;;  %1312 = vmatpush3.bf16.msra.mxu1 %v1432_v5  ;;  %v1483_v5 = vld [vmem:[#allocation11 + $0x94] ss:$8 sps:$4 sm:$0xff]  }
  0x80   :  { %518 = vmatprep.subr.bf16.mxu0 %v1395_v23  ;;  %1313 = vmatprep.subr.bf16.mxu1 %v1433_v6  ;;  %v1486_v6 = vld [vmem:[#allocation11 + $0x84] ss:$8 sps:$4 sm:$0xff]  }
  0x83   :  { %519 = vmatpush2.bf16.msra.mxu0 %v1393_v24  ;;  %1314 = vmatpush3.bf16.msra.mxu1 %v1434_v7 }
  0x84   :  { %520 = vmatprep.subr.bf16.mxu0 %v1398_v25  ;;  %1315 = vmatprep.subr.bf16.mxu1 %v1435_v8  ;;  %v1484_v8 = vld [vmem:[#allocation11 + $0x80] ss:$8 sps:$4 sm:$0xff]  }
  0x87   :  { %521 = vmatpush2.bf16.msra.mxu0 %v1396_v26  ;;  %1316 = vmatpush3.bf16.msra.mxu1 %v1436_v9 }
  0x88   :  { %522 = vmatprep.subr.bf16.mxu0 %v1401_v27  ;;  %1317 = vmatprep.subr.bf16.mxu1 %v1437_v10  ;;  %v1487_v10 = vld [vmem:[#allocation13 + $0x78] sm:$0xff]  }
  0x8b   :  { %523 = vmatpush2.bf16.msra.mxu0 %v1399_v28  ;;  %1318 = vmatpush3.bf16.msra.mxu1 %v1438_v11  ;;  %v1488_v11 = vld [vmem:[#allocation13 + $0x38] sm:$0xff]  }
  0x8c   :  { %524 = vmatprep.subr.bf16.mxu0 %v1404_v29  ;;  %942 = vmatprep.subr.bf16.mxu1 %v1441_v12  ;;  %v1489_v12 = vld [vmem:[#allocation13 + $0x70] sm:$0xff]  }
  0x8f   :  { %525 = vmatpush2.bf16.msra.mxu0 %v1402_v30 }
  0x90   :  { %526 = vmatprep.subr.bf16.mxu0 %v1407_v31 }
  0x93   :  { %527 = vmatpush2.bf16.msra.mxu0 %v1405_v32 }
  0x94   :  { %528 = vmatprep.subr.bf16.mxu0 %v1410_v33  ;;  %v1439_v33 = vld [vmem:[#allocation11 + $0x70] ss:$8 sps:$4 sm:$0xff]  }
  0x97   :  { %529 = vmatpush2.bf16.msra.mxu0 %v1408_v34 }
  0x98   :  { %530 = vmatprep.subr.bf16.mxu0 %v1413_v35 }
  0x9b   :  { %531 = vmatpush2.bf16.msra.mxu0 %v1411_v36  ;;  %v1444_v36 = vld [vmem:[#allocation11 + $0x64] ss:$8 sps:$4 sm:$0xff]  }
  0x9c   :  { %532 = vmatprep.subr.bf16.mxu0 %v1416_v37  ;;  %v1442_v37 = vld [vmem:[#allocation11 + $0x60] ss:$8 sps:$4 sm:$0xff]  }
  0x9f   :  { %533 = vmatpush2.bf16.msra.mxu0 %v1414_v38  ;;  %v1447_v38 = vld [vmem:[#allocation11 + $0x54] ss:$8 sps:$4 sm:$0xff]  }
  0xa0   :  { %1325 = vmatprep.subr.bf16.mxu0 %v1487_v10 }
 0x122   :  { %v244_v56 = vpop.f32.mrf.mxu0 }
 0x123   :  { %v245_v57 = vadd.f32 %v244_v56, %v149_v54  ;;  %v1460_v54 = vld [vmem:[#allocation11] ss:$8 sps:$4 sm:$0xff]   ;;  %v1463_v56 = vld [vmem:[#allocation11 + $0xf0] ss:$8 sps:$4 sm:$0xff]  }
 0x124   :  { %v246_v58 = vpop.f32.mrf.mxu0 }
 0x125   :  { %v247_v59 = vadd.f32 %v246_v58, %v153_v55  ;;  %1503 = vtanh.f32 %v245_v57  ;;  %v1465_v55 = vld [vmem:[#allocation11 + $0xf4] ss:$8 sps:$4 sm:$0xff]   ;;  %v1468_v57 = vld [vmem:[#allocation11 + $0xe4] ss:$8 sps:$4 sm:$0xff]   ;;  %v156_v58 = vsub.s32 2, %v1824_v50 }
 0x126   :  { %v248_v60 = vpop.f32.mrf.mxu0  ;;  %v1480_v50 = vld [vmem:[#allocation11 + $0xa4] ss:$8 sps:$4 sm:$0xff]  }
 0x127   :  { %1505 = vtanh.f32 %v247_v59  ;;  %v1466_v59 = vld [vmem:[#allocation11 + $0xe0] ss:$8 sps:$4 sm:$0xff]   ;;  %v1471_v60 = vld [vmem:[#allocation11 + $0xd4] ss:$8 sps:$4 sm:$0xff]  }
 0x128   :  { %v249_v61 = vpop.f32.mrf.mxu0 }
 0x129   :  { %v157_v61 = vrot.slane %v1829_v52, %v156_v58  ;;  %v1481_v52 = vld [vmem:[#allocation11 + $0x90] ss:$8 sps:$4 sm:$0xff]  }
 0x12e   :  { %v1838_v13 = vpop.f32.mrf.mxu1 }
 0x130   :  { %v287_v14 = vpop.f32.mrf.mxu1 }
 0x131   :  { %v288_v22 = vadd.f32 %v287_v14, %v161_v19  ;;  %v1491_v14 = vld [vmem:[#allocation13 + $0x68] sm:$0xff]   ;;  %v1496_v19 = vld [vmem:[#allocation13 + $0x18] sm:$0xff]  }
 0x132   :  { %v1504_v62 = vpop.eup %1503  ;;  %v289_v15 = vpop.f32.mrf.mxu1 }
 0x133   :  { %v296_v1 = vpack.c.bf16 %v1504_v62, %v1504_v62  ;;  %1507 = vtanh.f32 %v288_v22  ;;  %v1469_v62 = vld [vmem:[#allocation11 + $0xd0] ss:$8 sps:$4 sm:$0xff]   ;;  %v1492_v15 = vld [vmem:[#allocation13 + $0x28] sm:$0xff]  }
 0x134   :  { %v1506_v63 = vpop.eup %1505  ;;  %v290_v16 = vpop.f32.mrf.mxu1  ;;  %v1499_v22 = vld [vmem:[#allocation13 + $0x48] sm:$0xff]  }
 0x135   :  { %v297_v0 = vpack.c.bf16 %v1506_v63, %v1506_v63  ;;  %v1474_v63 = vld [vmem:[#allocation11 + $0xc4] ss:$8 sps:$4 sm:$0xff]  }
 0x136   :  { %v1493_v16 = vld [vmem:[#allocation13 + $0x60] sm:$0xff]  }
 0x137   :  { %534 = vmatprep.mubr.bf16.mxu0 %v297_v0  ;;  %v286_v0 = vadd.f32 %v1838_v13, %v157_v61  ;;  %v1490_v13 = vld [vmem:[#allocation13 + $0x30] sm:$0xff]  }
 0x138   :  { %535 = vmatmul.mubr.bf16.vlgmr.msra.gmra.mxu0 %v296_v1  ;;  %v1472_v1 = vld [vmem:[#allocation11 + $0xc0] ss:$8 sps:$4 sm:$0xff]  }
 0x139   :  { %1326 = vmatpush3.bf16.msra.mxu0 %v1488_v11 }
 0x13a   :  { %1327 = vmatprep.subr.bf16.mxu0 %v1489_v12 }
 0x13d   :  { %1328 = vmatpush3.bf16.msra.mxu0 %v1490_v13 }
 0x13e   :  { %1329 = vmatprep.subr.bf16.mxu0 %v1491_v14 }
 0x140   :  { %v1508_v29 = vpop.eup %1507 }
 0x141   :  { %v737_v34 = vpack.c.bf16 %v1508_v29, %v1508_v29  ;;  %1330 = vmatpush3.bf16.msra.mxu0 %v1492_v15  ;;  %v1237_v29 = vld [vmem:[%s1874_s6] ss:$0 sm:$0xff] }
 0x142   :  { %1331 = vmatprep.subr.bf16.mxu0 %v1493_v16 }
 0x145   :  { %1332 = vmatpush3.bf16.msra.mxu0 %v1494_v17 }
 0x146   :  { %1333 = vmatprep.subr.bf16.mxu0 %v1495_v18 }
 0x149   :  { %1334 = vmatpush3.bf16.msra.mxu0 %v1496_v19 }
 0x1f8   :  { %v536_v23 = vpop.f32.mrf.mxu0 }
 0x1f9   :  { %v537_v24 = vadd.f32 %v536_v23, %v335_v20  ;;  %v1497_v20 = vld [vmem:[#allocation13 + $0x50] sm:$0xff]   ;;  %v1500_v23 = vld [vmem:[#allocation13 + $0x8] sm:$0xff]  }
 0x1fa   :  { %v538_v25 = vpop.f32.mrf.mxu0  ;;  %1335 = vmatprep.subr.bf16.mxu0 %v1497_v20 }
 0x1fb   :  { %v539_v26 = vadd.f32 %v538_v25, %v339_v21  ;;  %1509 = vtanh.f32 %v537_v24  ;;  %v1498_v21 = vld [vmem:[#allocation13 + $0x10] sm:$0xff]   ;;  %v1501_v24 = vld [vmem:[#allocation13 + $0x40] sm:$0xff]  }
 0x1fc   :  { %v540_v27 = vpop.f32.mrf.mxu0  ;;  %1336 = vmatpush3.bf16.msra.mxu0 %v1498_v21  ;;  %v1502_v25 = vld [vmem:[#allocation13] sm:$0xff]  }
 0x1fd   :  { %1511 = vtanh.f32 %v539_v26  ;;  %1337 = vmatprep.subr.bf16.mxu0 %v1499_v22  ;;  %v723_v27 = vand.u32 127, %v146_v49 }
 0x1fe   :  { %v541_v28 = vpop.f32.mrf.mxu0  ;;  %1513 = vtanh.f32 %v286_v0 }
 0x1ff   :  { %vm724_vm1 = vcmp.lt.s32.totalorder %v723_v27, 6 }
 0x200   :  { %1338 = vmatpush3.bf16.msra.mxu0 %v1500_v23 }
 0x201   :  { %1339 = vmatprep.subr.bf16.mxu0 %v1501_v24 }
 0x204   :  { %1340 = vmatpush3.bf16.msra.mxu0 %v1502_v25 }
 0x208   :  { %v1510_v30 = vpop.eup %1509 }
 0x209   :  { %v545_v35 = vpack.c.bf16 %v1510_v30, %v1510_v30 }
 0x20a   :  { %v1512_v31 = vpop.eup %1511 }
 0x20b   :  { %v546_v32 = vpack.c.bf16 %v1512_v31, %v1512_v31  ;;  %v1514_v7 = vpop.eup %1513 }
 0x20c   :  { %v736_v9 = vpack.c.bf16 %v1514_v7, %v1514_v7 }
 0x20d   :  { %714 = vmatprep.mubr.bf16.mxu1 %v546_v32 }
 0x20e   :  { %715 = vmatmul.mubr.bf16.vlgmr.msra.gmra.mxu1 %v545_v35  ;;  %v770_v35 = vld [vmem:[%s1876_s8] sm:$0x3] }
 0x20f   :  { %943 = vmatpush1.bf16.msra.mxu1 %v1439_v33  ;;  %974 = vmatprep.mubr.bf16.mxu1 %v737_v34  ;;  %v779_v49 = vrot.slane %v770_v35, %v1832_v53 }
 0x210   :  { %944 = vmatprep.subr.bf16.mxu1 %v1444_v36  ;;  %v775_v36 = vrot.slane %v770_v35, %v1827_v51 }
 0x213   :  { %945 = vmatpush1.bf16.msra.mxu1 %v1442_v37 }
 0x214   :  { %946 = vmatprep.subr.bf16.mxu1 %v1447_v38 }
 0x217   :  { %947 = vmatpush1.bf16.msra.mxu1 %v1445_v39 }
 0x218   :  { %948 = vmatprep.subr.bf16.mxu1 %v1450_v40 }
 0x21b   :  { %949 = vmatpush1.bf16.msra.mxu1 %v1448_v41 }
 0x21c   :  { %950 = vmatprep.subr.bf16.mxu1 %v1453_v42 }
 0x21f   :  { %951 = vmatpush1.bf16.msra.mxu1 %v1451_v43 }
 0x220   :  { %952 = vmatprep.subr.bf16.mxu1 %v1456_v44 }
 0x223   :  { %953 = vmatpush1.bf16.msra.mxu1 %v1454_v45 }
 0x224   :  { %954 = vmatprep.subr.bf16.mxu1 %v1459_v46 }
 0x227   :  { %955 = vmatpush1.bf16.msra.mxu1 %v1457_v47 }
 0x228   :  { %956 = vmatprep.subr.bf16.mxu1 %v1462_v48 }
 0x22b   :  { %957 = vmatpush1.bf16.msra.mxu1 %v1460_v54 }
 0x22c   :  { %958 = vmatprep.subr.bf16.mxu1 %v1465_v55  ;;  %v1286_v55 = vld [vmem:[%s1878_s10] ss:$0 sm:$0xff] }
 0x22f   :  { %959 = vmatpush2.bf16.msra.mxu1 %v1463_v56 }
 0x230   :  { %960 = vmatprep.subr.bf16.mxu1 %v1468_v57 }
 0x233   :  { %961 = vmatpush2.bf16.msra.mxu1 %v1466_v59 }
 0x234   :  { %962 = vmatprep.subr.bf16.mxu1 %v1471_v60 }
 0x237   :  { %963 = vmatpush2.bf16.msra.mxu1 %v1469_v62 }
 0x238   :  { %964 = vmatprep.subr.bf16.mxu1 %v1474_v63 }
 0x23b   :  { %965 = vmatpush2.bf16.msra.mxu1 %v1472_v1 }
 0x23c   :  { %966 = vmatprep.subr.bf16.mxu1 %v1477_v2 }
 0x23f   :  { %967 = vmatpush2.bf16.msra.mxu1 %v1475_v3 }
 0x240   :  { %968 = vmatprep.subr.bf16.mxu1 %v1480_v50 }
 0x243   :  { %969 = vmatpush2.bf16.msra.mxu1 %v1478_v4 }
 0x244   :  { %970 = vmatprep.subr.bf16.mxu1 %v1483_v5 }
 0x247   :  { %971 = vmatpush2.bf16.msra.mxu1 %v1481_v52 }
 0x248   :  { %972 = vmatprep.subr.bf16.mxu1 %v1486_v6 }
 0x24b   :  { %973 = vmatpush2.bf16.msra.mxu1 %v1484_v8 }
 0x24e   :  { %975 = vmatmul.mubr.bf16.vlgmr.msra.gmra.mxu1 %v736_v9 }
 0x2ce   :  { %v1319_v26 = vpop.f32.mrf.mxu1 }
 0x2d0   :  { %v1320_v28 = vpop.f32.mrf.mxu1 }
 0x2d1   :  { %v1321_v30 = vadd.f32 %v1320_v28, %v1319_v26 }
 0x2d2   :  { %v1322_v31 = vpop.f32.mrf.mxu1 }
 0x2d3   :  { %v717_v32 = vadd.f32 %v1321_v30, %v1237_v29 }
 0x2d4   :  { %v1323_v33 = vpop.f32.mrf.mxu1 }
 0x2d5   :  { %v725_v34 = vsel %vm724_vm1, %v717_v32, -inf }
 0x2d6   :  { %726 = vmax.xlane.f32.xlu0 %v725_v34 }
 0x30e   :  { %v976_v37 = vpop.f32.mrf.mxu1 }
 0x30f   :  { %v977_v38 = vadd.f32 %v976_v37, %v775_v36 }
 0x310   :  { %v978_v39 = vpop.f32.mrf.mxu1 }
 0x311   :  { %1515 = vtanh.f32 %v977_v38  ;;  %v979_v40 = vadd.f32 %v978_v39, %v779_v49 }
 0x312   :  { %v980_v41 = vpop.f32.mrf.mxu1 }
 0x313   :  { %1517 = vtanh.f32 %v979_v40 }
 0x314   :  { %v981_v42 = vpop.f32.mrf.mxu1 }
 0x31e   :  { %v1516_v43 = vpop.eup %1515 }
 0x31f   :  { %v985_v45 = vpack.c.bf16 %v1516_v43, %v1516_v43 }
 0x320   :  { %v1518_v44 = vpop.eup %1517 }
 0x321   :  { %v986_v46 = vpack.c.bf16 %v1518_v44, %v1518_v44 }
 0x323   :  { %1154 = vmatprep.mubr.bf16.mxu0 %v986_v46 }
 0x324   :  { %1155 = vmatmul.mubr.bf16.vlgmr.msra.gmra.mxu0 %v985_v45 }
 0x35f   :  { %v727_v47 = vpop.xlane.xlu0 %726 }
 0x360   :  { %v728_v48 = vsub.f32 %v725_v34, %v727_v47 }
 0x362   :  { %v729_v54 = vmul.f32 1.442695, %v728_v48 }
 0x364   :  { %1519 = vpow2.f32 %v729_v54 }
 0x371   :  { %v1520_v51 = vpop.eup %1519 }
 0x372   :  { %731 = vadd.xlane.f32.xlu0 %v1520_v51 }
 0x3e4   :  { %v1341_v53 = vpop.f32.mrf.mxu0 }
 0x3e6   :  { %v1342_v56 = vpop.f32.mrf.mxu0 }
 0x3e7   :  { %v1343_v57 = vadd.f32 %v1342_v56, %v1341_v53 }
 0x3e8   :  { %v1344_v58 = vpop.f32.mrf.mxu0 }
 0x3e9   :  { %v1157_v59 = vadd.f32 %v1343_v57, %v1286_v55 }
 0x3ea   :  { %v1345_v60 = vpop.f32.mrf.mxu0 }
 0x3eb   :  { %1162 = vst [vmem:[#allocation15] sm:$0xff] %v1157_v59 }
 0x3ec   :  { %1674 = shalt.err (!%p1671_p11)
}
 0x3ed   :  { %1182 = dma.vmem_to_hbm [thread:$0]  %s1180_s3, 128, %s1880_s12, [#allocation16]  }
 0x3ee   :  { %s1730_s10 = smov [#allocation14]  }
 0x3ef   :  { %s1169_s27 = sshll.u32 %s1730_s10, 4  ;;  %s1170_s27 = int_to_ptr.vmem [resolvable:$true] %s1169_s27 }
 0x3f0   :  { %s1683_s28 = scalar_lea.vmem %s1170_s27, 128  ;;  %p1688_p13 = scmp.lt.s32.totalorder %s1170_s27, %s1170_s27 }
 0x3f1   :  { %p1684_p12 = scmp.ne.s32.totalorder %s1170_s27, %s1683_s28  ;;  %p1689_p0 = scmp.lt.s32.totalorder %s1683_s28, %s1683_s28 }
 0x3f3   :  { %p1690_p1 = por %p1689_p0, %p1688_p13 }
 0x3f5   :  { %p1691_p2 = pnand %p1690_p1, %p1684_p12 }
 0x3fb   :  { %v732_v61 = vpop.xlane.xlu0 %731 }
 0x3fc   :  { %1521 = vrcp.f32 %v732_v61 }
 0x409   :  { %v1522_v62 = vpop.eup %1521 }
 0x40a   :  { %v734_v63 = vmul.f32 %v1522_v62, %v1520_v51 }
 0x40c   :  { %735 = vst [vmem:[#allocation14] sm:$0xff] %v734_v63 }
 0x40d   :  { %1694 = shalt.err (!%p1691_p2)
}
 0x40e   :  { %1172 = dma.vmem_to_hbm [thread:$0]  %s1170_s27, 128, %s1879_s11, [#allocation4]  }
 0x40f   :  { %1711 = dma.done.wait [#allocation4], 128  }
 0x410   :  { %1712 = vsyncadd [#allocation4], 4294967168 }
 0x411   :  { %1713 = dma.done.wait [#allocation16], 128  }
 0x412   :  { %1714 = vsyncadd [#allocation16], 4294967168 }
 0x413   :  { %1189 = vsyncpa [#allocation3], 1 }
 0x414   :  { %1190 = vsyncpa [#allocation6], 1 }
 0x415   :  { %1191 = vsyncpa [#allocation9], 1 }
 0x416   :  { %1192 = vsyncpa [#allocation12], 1 }
 0x417   :  { %1193 = vsyncpa [#allocation4], 1 }
 0x418   :  { %1194 = vsyncpa [#allocation16], 1 }

</bundles_post_ra>
